<compile_context>
chip_gen: v7x
topology: tpu7x:2x2x1
jax: 0.10.0
libtpu: 0.0.40
codegen_flags: <defaults>
</compile_context>

<pallas_src>
import functools

import jax
import jax.numpy as jnp
from jax.experimental import pallas as pl
from jax.experimental.pallas import tpu as pltpu


_MAX_BLOCK_ROWS = 1024      # HBM roofline flattens past ~512-1024 rows/tile
_MIN_BLOCK_ROWS = 8         # sublane alignment floor
_TARGET_GRID_STEPS = 8      # enough steps for DMA overlap + balanced 2-TC split


def _round_up(a, b):
    return ((a + b - 1) // b) * b


@functools.lru_cache(maxsize=None)
def _vmem_budgets():
    """(tile_budget_bytes, vmem_limit_bytes), derived from the chip generation."""
    try:
        cap = int(getattr(pltpu.get_tpu_info(), "vmem_capacity_bytes", 64 << 20))
    except Exception:            # non-TPU / interpret environments
        cap = 64 << 20
    # 32 MiB scoped limit on v7x (64 MiB physical); 48 MiB on v5e/v6e (128 MiB).
    vmem_limit = min(cap // 2, 48 << 20)
    # Keep the I/O double-buffers + f32 temporaries to half the scoped limit,
    # leaving headroom for compiler scratch.
    tile_budget = vmem_limit // 2
    return tile_budget, vmem_limit


def _choose_block_rows(n, c, in_itemsize, tile_budget):
    """Largest row tile fitting the VMEM budget, capped for pipeline overlap."""
    lanes = _round_up(max(c, 128), 128)          # class dim pads to 128 lanes
    # 2 inputs x 2 pipeline buffers at the input dtype, plus ~4 single-buffered
    # f32 (TM, C) temporaries materialized by the body (upcasts, e, pred, y_log).
    bytes_per_row = 2 * 2 * lanes * in_itemsize + 4 * lanes * 4 + 64
    br = min(_MAX_BLOCK_ROWS, tile_budget // bytes_per_row)
    # Keep >= _TARGET_GRID_STEPS grid steps when N allows it: the software
    # pipeline gets DMA/compute overlap and v7x's 2 TCs stay balanced.
    br = min(br, max(128, _round_up(pl.cdiv(n, _TARGET_GRID_STEPS), 128)))
    br = max(_MIN_BLOCK_ROWS, (br // _MIN_BLOCK_ROWS) * _MIN_BLOCK_ROWS)
    if br >= n:
        return n                                 # single block == full array dims
    # TODO(synk): for very large C (>~100k classes) add an 'arbitrary' grid axis
    # over C with online-softmax accumulators instead of relying on the 8-row floor.
    return br


def _rsce_kernel(x_ref, y_ref, loss_ref, *, fast_math):
    """x_ref, y_ref: (TM, C) tiles in VMEM; loss_ref: (TM, 1) per-sample losses."""
    x = x_ref[...].astype(jnp.float32)
    m = jnp.max(x, axis=-1, keepdims=True)       # numerically stable softmax
    xs = x - m
    if fast_math:
        # bf16 EUP path (v6e/v7x run bf16 exp/log ~2x f32); row sums stay f32.
        e = jnp.exp(xs.astype(jnp.bfloat16)).astype(jnp.float32)
        y_log = jnp.log(jnp.clip(y_ref[...].astype(jnp.bfloat16), 1e-4, 1.0)
                        ).astype(jnp.float32)
        denom = jnp.sum(e, axis=-1, keepdims=True)
        num = jnp.sum(y_log * e, axis=-1, keepdims=True)
        # Factored reciprocal: skips the exact clamp(pred, 1e-7) (<=~1e-6/class).
        loss_ref[...] = -(num * pl.reciprocal(denom, approx=True))
    else:
        # Exact path: matches the PyTorch reference math in f32.
        e = jnp.exp(xs)
        denom = jnp.sum(e, axis=-1, keepdims=True)
        pred = jnp.clip(e / denom, 1e-7, 1.0)
        y_log = jnp.log(jnp.clip(y_ref[...].astype(jnp.float32), 1e-4, 1.0))
        loss_ref[...] = -jnp.sum(y_log * pred, axis=-1, keepdims=True)


@functools.partial(jax.jit, static_argnames=("reduction", "fast_math"))
def reverse_soft_target_cross_entropy(x, y, reduction="mean", fast_math=False):
    """x: (..., C) logits, y: (..., C) soft targets (class dim last).

    Math is f32 inside the kernel (pass bf16 inputs to halve HBM traffic on
    this memory-bound op).  fast_math=True opts into bf16 EUP exp/log and an
    approximate reciprocal (useful on v6e/v7x when EUP becomes the bound).
    Returns f32.
    """
    assert x.shape == y.shape and x.ndim >= 1
    *lead, c = x.shape
    x2 = x.reshape(-1, c)
    y2 = y.reshape(-1, c)
    n = x2.shape[0]

    itemsize = max(jnp.dtype(x2.dtype).itemsize, jnp.dtype(y2.dtype).itemsize)
    tile_budget, vmem_limit = _vmem_budgets()
    block_rows = _choose_block_rows(n, c, itemsize, tile_budget)
    grid = (pl.cdiv(n, block_rows),)             # partial last block: OOB rows are
                                                 # row-local garbage, store is masked

    per_sample = pl.pallas_call(
        functools.partial(_rsce_kernel, fast_math=fast_math),
        out_shape=jax.ShapeDtypeStruct((n, 1), jnp.float32),
        grid_spec=pltpu.PrefetchScalarGridSpec(
            num_scalar_prefetch=0,
            grid=grid,
            in_specs=[
                pl.BlockSpec((block_rows, c), lambda i: (i, 0)),
                pl.BlockSpec((block_rows, c), lambda i: (i, 0)),
            ],
            out_specs=pl.BlockSpec((block_rows, 1), lambda i: (i, 0)),
        ),
        compiler_params=pltpu.CompilerParams(
            # "parallel" lets megacore / v7x split the row axis across TCs.
            # If a v7x profile shows one TC idle, switch to pltpu.CORE_PARALLEL.
            dimension_semantics=("parallel",),
            vmem_limit_bytes=vmem_limit,
        ),
    )(x2, y2)

    loss = per_sample[:, 0]                      # (N,) valid rows only
    if reduction == "mean":
        # TODO(synk): a per-block partial-sum output would save one tiny HBM
        # round-trip here; kept simple since it is a sub-µs-level win.
        return jnp.mean(loss)
    elif reduction == "none":
        return loss.reshape(tuple(lead))
    else:
        raise NotImplementedError(reduction)


def _reference(x, y, reduction="mean"):
    xf = x.astype(jnp.float32)
    yf = y.astype(jnp.float32)
    pred = jax.nn.softmax(xf, axis=-1)
    pred = jnp.clip(pred, 1e-7, 1.0)
    yl = jnp.log(jnp.clip(yf, 1e-4, 1.0))
    loss = -jnp.sum(yl * pred, axis=-1)
    return jnp.mean(loss) if reduction == "mean" else loss


if __name__ == "__main__":
    key = jax.random.PRNGKey(0)
    kx, ky, kx2, ky2 = jax.random.split(key, 4)

    # Small shapes consistent with a MixUp classification head: batch=16, classes=32.
    N, C = 16, 32
    x = jax.random.normal(kx, (N, C), dtype=jnp.float32)
    y = jax.nn.softmax(2.0 * jax.random.normal(ky, (N, C), dtype=jnp.float32), axis=-1)

    out_mean = jax.block_until_ready(
        reverse_soft_target_cross_entropy(x, y, reduction="mean"))
    out_none = jax.block_until_ready(
        reverse_soft_target_cross_entropy(x, y, reduction="none"))
    assert out_none.shape == (N,)
    assert jnp.allclose(out_mean, _reference(x, y, "mean"), atol=1e-3, rtol=1e-3)
    assert jnp.allclose(out_none, _reference(x, y, "none"), atol=1e-3, rtol=1e-3)

    # Larger, non-tile-aligned case: multi-step parallel grid + masked partial
    # last block (N % block_rows != 0).
    N2, C2 = 1500, 64
    x2 = jax.random.normal(kx2, (N2, C2), dtype=jnp.float32)
    y2 = jax.nn.softmax(2.0 * jax.random.normal(ky2, (N2, C2), dtype=jnp.float32), axis=-1)
    out2 = jax.block_until_ready(
        reverse_soft_target_cross_entropy(x2, y2, reduction="none"))
    assert out2.shape == (N2,)
    assert jnp.allclose(out2, _reference(x2, y2, "none"), atol=1e-3, rtol=1e-3)

    # bf16 inputs: half the HBM bytes; kernel upcasts to f32 internally.
    xb, yb = x2.astype(jnp.bfloat16), y2.astype(jnp.bfloat16)
    outb = jax.block_until_ready(
        reverse_soft_target_cross_entropy(xb, yb, reduction="mean"))
    assert jnp.allclose(outb, _reference(xb, yb, "mean"), atol=1e-2, rtol=1e-2)

    # Opt-in fast_math path (bf16 EUP exp/log + approx reciprocal): loose tolerance.
    outf = jax.block_until_ready(
        reverse_soft_target_cross_entropy(x2, y2, reduction="none", fast_math=True))
    assert outf.shape == (N2,)
    assert jnp.allclose(outf, _reference(x2, y2, "none"), atol=1e-1, rtol=5e-2)

    print("KERNEL_OK")
</pallas_src>

<mosaic_0001>
module attributes {stable_mosaic.version = 11 : i64} {
  func.func @_rsce_kernel(%arg0: i32, %arg1: memref<16x32xf32, #tpu.memory_space<vmem>>, %arg2: memref<16x32xf32, #tpu.memory_space<vmem>>, %arg3: memref<16x1xf32, #tpu.memory_space<vmem>>) attributes {dimension_semantics = [#tpu.dimension_semantics<parallel>], iteration_bounds = array<i64: 1>, scalar_prefetch = 0 : i64, scratch_operands = 0 : i64, tpu.core_type = #tpu.core_type<tc>, window_params = [{transform_indices = @transform_0, window_bounds = array<i64: 16, 32>}, {transform_indices = @transform_1, window_bounds = array<i64: 16, 32>}, {transform_indices = @transform_2, window_bounds = array<i64: 16, 1>}]} {
    %c0 = arith.constant 0 : index
    %c0_0 = arith.constant 0 : index
    %0 = vector.load %arg1[%c0, %c0_0] : memref<16x32xf32, #tpu.memory_space<vmem>>, vector<16x32xf32>
    %cst = arith.constant dense<0xFF800000> : vector<16xf32>
    %1 = vector.multi_reduction <maximumf>, %0, %cst [1] : vector<16x32xf32> to vector<16xf32>
    %2 = vector.shape_cast %1 : vector<16xf32> to vector<16x1xf32>
    %3 = vector.broadcast %2 : vector<16x1xf32> to vector<16x32xf32>
    %4 = arith.subf %0, %3 : vector<16x32xf32>
    %5 = math.exp %4 : vector<16x32xf32>
    %cst_1 = arith.constant dense<0.000000e+00> : vector<16xf32>
    %6 = vector.multi_reduction <add>, %5, %cst_1 [1] : vector<16x32xf32> to vector<16xf32>
    %7 = vector.shape_cast %6 : vector<16xf32> to vector<16x1xf32>
    %8 = vector.broadcast %7 : vector<16x1xf32> to vector<16x32xf32>
    %9 = arith.divf %5, %8 : vector<16x32xf32>
    %cst_2 = arith.constant 1.000000e-07 : f32
    %cst_3 = arith.constant 1.000000e+00 : f32
    %10 = vector.broadcast %cst_2 : f32 to vector<16x32xf32>
    %11 = arith.maximumf %10, %9 : vector<16x32xf32>
    %12 = vector.broadcast %cst_3 : f32 to vector<16x32xf32>
    %13 = arith.minimumf %12, %11 : vector<16x32xf32>
    %c0_4 = arith.constant 0 : index
    %c0_5 = arith.constant 0 : index
    %14 = vector.load %arg2[%c0_4, %c0_5] : memref<16x32xf32, #tpu.memory_space<vmem>>, vector<16x32xf32>
    %cst_6 = arith.constant 9.99999974E-5 : f32
    %cst_7 = arith.constant 1.000000e+00 : f32
    %15 = vector.broadcast %cst_6 : f32 to vector<16x32xf32>
    %16 = arith.maximumf %15, %14 : vector<16x32xf32>
    %17 = vector.broadcast %cst_7 : f32 to vector<16x32xf32>
    %18 = arith.minimumf %17, %16 : vector<16x32xf32>
    %19 = math.log %18 : vector<16x32xf32>
    %20 = arith.mulf %19, %13 : vector<16x32xf32>
    %cst_8 = arith.constant dense<0.000000e+00> : vector<16xf32>
    %21 = vector.multi_reduction <add>, %20, %cst_8 [1] : vector<16x32xf32> to vector<16xf32>
    %22 = vector.shape_cast %21 : vector<16xf32> to vector<16x1xf32>
    %cst_9 = arith.constant 0.000000e+00 : f32
    %23 = vector.broadcast %cst_9 : f32 to vector<16x1xf32>
    %24 = arith.subf %23, %22 : vector<16x1xf32>
    %c0_10 = arith.constant 0 : index
    %c0_11 = arith.constant 0 : index
    %25 = vector.load %arg3[%c0_10, %c0_11] : memref<16x1xf32, #tpu.memory_space<vmem>>, vector<16x1xf32>
    tpu.vector_store %arg3[%c0_10, %c0_11], %24 {strides = array<i32>} : memref<16x1xf32, #tpu.memory_space<vmem>>, vector<16x1xf32>,
    return
  }
  func.func @transform_0(%arg0: i32) -> (i32, i32) {
    %c0_i32 = arith.constant 0 : i32
    %c0_i32_0 = arith.constant 0 : i32
    return %arg0, %c0_i32 : i32, i32
  }
  func.func @transform_1(%arg0: i32) -> (i32, i32) {
    %c0_i32 = arith.constant 0 : i32
    %c0_i32_0 = arith.constant 0 : i32
    return %arg0, %c0_i32 : i32, i32
  }
  func.func @transform_2(%arg0: i32) -> (i32, i32) {
    %c0_i32 = arith.constant 0 : i32
    %c0_i32_0 = arith.constant 0 : i32
    return %arg0, %c0_i32 : i32, i32
  }
}

</mosaic_0001>

<bundles_post_ra>
// kernel: reverse_soft_target_cross_entropy.1
= control target key start
LH: loop header
LB: loop body
LE: loop exit
PB: predicated region body
PF: predicated region fallthrough
CT: control target
= control target key end

     0   :  { %7 = vsyncpa [#allocation3], 0  ;;  %s216_s0 = inlined_call_operand.hbm [shape: f32[16,32], index: 0, kind: input, shape index: {}]   ;;  %s217_s1 = inlined_call_operand.hbm [shape: f32[16,32], index: 1, kind: input, shape index: {}]   ;;  %s218_s2 = inlined_call_operand.vmem [shape: f32[16,1], index: 2, kind: output, shape index: {}]  }
   0x1   :  { %8 = vsyncpa [#allocation5], 0  ;;  %s161_s9 = smov [#allocation2]   ;;  %s113_s13 = scalar_lea.hbm %s216_s0, 256 }
   0x2   :  { %s14_s10 = sshll.u32 %s161_s9, 4  ;;  %p114_p0 = scmp.ne.s32.totalorder %s216_s0, %s113_s13  ;;  %s15_s10 = int_to_ptr.vmem [resolvable:$true] %s14_s10 }
   0x3   :  { %p117_p1 = scmp.lt.u32.totalorder %s113_s13, %s216_s0 }
   0x5   :  { %p119_p2 = pnand %p117_p1, %p114_p0 }
   0x7   :  { %122 = shalt.err (!%p119_p2)
}
   0x8   :  { %s123_s18 = scalar_lea.vmem %s15_s10, 256  ;;  %p128_p4 = scmp.lt.s32.totalorder %s15_s10, %s15_s10 }
   0x9   :  { %p124_p3 = scmp.ne.s32.totalorder %s15_s10, %s123_s18  ;;  %p129_p5 = scmp.lt.s32.totalorder %s123_s18, %s123_s18 }
   0xb   :  { %p130_p6 = por %p129_p5, %p128_p4 }
   0xd   :  { %p131_p7 = pnand %p130_p6, %p124_p3 }
   0xf   :  { %134 = shalt.err (!%p131_p7)
}
  0x10   :  { %s162_s19 = smov 128   ;;  %s163_s20 = smov 8  }
  0x11   :  { %20 = dma.hbm_to_vmem [thread:$0]  %s216_s0, 256, %s15_s10, [#allocation3], %s162_s19, %s162_s19, %s163_s20  }
  0x12   :  { %s164_s23 = smov [#allocation4]   ;;  %s135_s27 = scalar_lea.hbm %s217_s1, 256 }
  0x13   :  { %s26_s24 = sshll.u32 %s164_s23, 4  ;;  %p136_p8 = scmp.ne.s32.totalorder %s217_s1, %s135_s27  ;;  %s27_s24 = int_to_ptr.vmem [resolvable:$true] %s26_s24 }
  0x14   :  { %p139_p9 = scmp.lt.u32.totalorder %s135_s27, %s217_s1 }
  0x16   :  { %p141_p10 = pnand %p139_p9, %p136_p8 }
  0x18   :  { %144 = shalt.err (!%p141_p10)
}
  0x19   :  { %s145_s4 = scalar_lea.vmem %s27_s24, 256  ;;  %p150_p12 = scmp.lt.s32.totalorder %s27_s24, %s27_s24 }
  0x1a   :  { %p146_p11 = scmp.ne.s32.totalorder %s27_s24, %s145_s4  ;;  %p151_p13 = scmp.lt.s32.totalorder %s145_s4, %s145_s4 }
  0x1c   :  { %p152_p0 = por %p151_p13, %p150_p12 }
  0x1e   :  { %p153_p1 = pnand %p152_p0, %p146_p11 }
  0x20   :  { %156 = shalt.err (!%p153_p1)
}
  0x21   :  { %32 = dma.hbm_to_vmem [thread:$0]  %s217_s1, 256, %s27_s24, [#allocation5], %s162_s19, %s162_s19, %s163_s20  }
  0x22   :  { %157 = dma.done.wait [#allocation3], 256  }
  0x23   :  { %158 = vsyncadd [#allocation3], 4294967040 }
  0x24   :  { %159 = dma.done.wait [#allocation5], 256  }
  0x25   :  { %160 = vsyncadd [#allocation5], 4294967040  ;;  %vm41_vm0 = vcmask 261120   ;;  %v39_v0 = vld [vmem:[#allocation2] sm:$0xff]  ;;  %v40_v1 = vld [vmem:[#allocation2 + $0x8] sm:$0xff]  ;;  %vm88_vm1 = vcmask 7168  }
  0x26   :  { %v42_v2 = vsel %vm41_vm0, %v39_v0, -inf  ;;  %v45_v3 = vsel %vm41_vm0, %v40_v1, -inf  ;;  %v68_v14 = vld [vmem:[#allocation4] sm:$0xff]  ;;  %v69_v16 = vld [vmem:[#allocation4 + $0x8] sm:$0xff] }
  0x27   :  { %43 = vmax.xlane.f32.xlu0 %v42_v2  ;;  %v70_v15 = vmax.f32 %v68_v14, 0.0001  ;;  %v71_v18 = vmax.f32 %v69_v16, 0.0001 }
  0x29   :  { %v72_v17 = vmin.f32 %v70_v15, 1.0  ;;  %v73_v20 = vmin.f32 %v71_v18, 1.0 }
  0x2b   :  { %46 = vmax.xlane.f32.xlu0 %v45_v3 }
  0xb4   :  { %v44_v4 = vpop.xlane.xlu0 %43 }
  0xb5   :  { %v48_v5 = vsub.f32 %v39_v0, %v44_v4 }
  0xb7   :  { %v50_v6 = vmul.f32 1.442695, %v48_v5 }
  0xb8   :  { %v47_v7 = vpop.xlane.xlu0 %46 }
  0xb9   :  { %101 = vpow2.f32 %v50_v6  ;;  %v49_v8 = vsub.f32 %v40_v1, %v47_v7 }
  0xbb   :  { %v52_v9 = vmul.f32 1.442695, %v49_v8 }
  0xbd   :  { %103 = vpow2.f32 %v52_v9 }
  0xbe   :  { %105 = vlog2.f32 %v72_v17 }
  0xc3   :  { %v102_v10 = vpop.eup %101 }
  0xc4   :  { %v54_v11 = vsel %vm41_vm0, %v102_v10, 0.0 }
  0xc5   :  { %55 = vadd.xlane.f32.xlu1 %v54_v11 }
  0xc7   :  { %v104_v12 = vpop.eup %103 }
  0xc8   :  { %v57_v13 = vsel %vm41_vm0, %v104_v12, 0.0  ;;  %v106_v22 = vpop.eup %105 }
  0xc9   :  { %58 = vadd.xlane.f32.xlu1 %v57_v13  ;;  %v75_v27 = vmul.f32 0.6931472, %v106_v22 }
 0x152   :  { %v56_v19 = vpop.xlane.xlu1 %55 }
 0x153   :  { %107 = vrcp.f32 %v56_v19 }
 0x154   :  { %109 = vlog2.f32 %v73_v20 }
 0x156   :  { %v59_v21 = vpop.xlane.xlu1 %58 }
 0x157   :  { %111 = vrcp.f32 %v59_v21 }
 0x15d   :  { %v108_v23 = vpop.eup %107 }
 0x15e   :  { %v61_v24 = vmul.f32 %v108_v23, %v102_v10  ;;  %v110_v25 = vpop.eup %109 }
 0x15f   :  { %v77_v33 = vmul.f32 0.6931472, %v110_v25 }
 0x160   :  { %v64_v26 = vmax.f32 %v61_v24, 1e-07 }
 0x161   :  { %v112_v28 = vpop.eup %111 }
 0x162   :  { %v66_v29 = vmin.f32 %v64_v26, 1.0  ;;  %v63_v30 = vmul.f32 %v112_v28, %v104_v12 }
 0x164   :  { %v78_v31 = vmul.f32 %v75_v27, %v66_v29  ;;  %v65_v32 = vmax.f32 %v63_v30, 1e-07 }
 0x166   :  { %v80_v34 = vsel %vm41_vm0, %v78_v31, 0.0  ;;  %v67_v35 = vmin.f32 %v65_v32, 1.0 }
 0x167   :  { %81 = vadd.xlane.f32.xlu0 %v80_v34 }
 0x168   :  { %v79_v36 = vmul.f32 %v77_v33, %v67_v35 }
 0x16a   :  { %v83_v37 = vsel %vm41_vm0, %v79_v36, 0.0 }
 0x16b   :  { %84 = vadd.xlane.f32.xlu1 %v83_v37 }
 0x1f4   :  { %v82_v38 = vpop.xlane.xlu0 %81 }
 0x1f5   :  { %v86_v39 = vsub.f32 0.0, %v82_v38 }
 0x1f7   :  { %89 = vst.msk [vmem:[%s218_s2] sm:$0xff] %vm88_vm1, %v86_v39 }
 0x1f8   :  { %v85_v40 = vpop.xlane.xlu1 %84 }
 0x1f9   :  { %v87_v41 = vsub.f32 0.0, %v85_v40 }
 0x1fb   :  { %90 = vst.msk [vmem:[%s218_s2 + $0x8] sm:$0xff] %vm88_vm1, %v87_v41 }
 0x1fc   :  { %95 = vsyncpa [#allocation3], 1 }
 0x1fd   :  { %96 = vsyncpa [#allocation5], 1 }

</bundles_post_ra>
